<compile_context>
chip_gen: v5e
topology: v5e:2x2
jax: 0.10.0
libtpu: 0.0.40
codegen_flags: <defaults>
</compile_context>

<pallas_src>
import jax
import jax.numpy as jnp
from jax.experimental import pallas as pl
from jax.experimental.pallas import tpu as pltpu

_LANES = 128
_MAX_LANE_WIDTH = 4096           # lane-dense last dim (multiple of 128)
_TARGET_BLOCK_BYTES = 2 << 20    # ~2 MiB per block (generation-safe)


def _copy_kernel(x_ref, o_ref):
    # Pure element copy of the current (block_rows, C) block.
    o_ref[...] = x_ref[...]


def _resolve_shape(shape, total):
    """Resolve a single -1 entry like torch .view does."""
    shape = list(shape)
    if -1 in shape:
        idx = shape.index(-1)
        known = 1
        for i, s in enumerate(shape):
            if i != idx:
                known *= s
        assert total % known == 0, "invalid shape for view"
        shape[idx] = total // known
    prod = 1
    for s in shape:
        prod *= s
    assert prod == total, "view shape must preserve element count"
    return tuple(shape)


def _choose_lane_width(total):
    """Largest multiple of 128 (<= _MAX_LANE_WIDTH) that divides total."""
    c = _MAX_LANE_WIDTH
    while c >= _LANES:
        if total % c == 0:
            return c
        c -= _LANES
    return None


def _pallas_identity_copy(flat, total, itemsize):
    """Identity copy of a flat, lane-aligned buffer through a Pallas kernel."""
    lane_width = _choose_lane_width(total)
    rows = total // lane_width
    slab = jnp.reshape(flat, (rows, lane_width))

    # Block rows: as large as possible under the ~2 MiB budget.  Use the full
    # row extent when the whole slab is small (always a legal block dim);
    # otherwise a multiple of 32 rows (covers f32/bf16/int8 packing).
    max_rows = max(1, _TARGET_BLOCK_BYTES // (lane_width * itemsize))
    if rows <= max_rows:
        block_rows = rows
    else:
        block_rows = max(32, (max_rows // 32) * 32)

    grid = (pl.cdiv(rows, block_rows),)

    copied = pl.pallas_call(
        _copy_kernel,
        out_shape=jax.ShapeDtypeStruct((rows, lane_width), slab.dtype),
        grid_spec=pltpu.PrefetchScalarGridSpec(
            num_scalar_prefetch=0,
            grid=grid,
            in_specs=[pl.BlockSpec((block_rows, lane_width), lambda i: (i, 0))],
            out_specs=pl.BlockSpec((block_rows, lane_width), lambda i: (i, 0)),
        ),
        # Let XLA donate/alias the input buffer instead of allocating a second
        # full-size HBM array.
        input_output_aliases={0: 0},
        cost_estimate=pl.CostEstimate(
            flops=0, transcendentals=0, bytes_accessed=2 * total * itemsize),
        compiler_params=pltpu.CompilerParams(
            dimension_semantics=("parallel",)),
    )(slab)

    return jnp.reshape(copied, (-1,))


class Reshape:
    """JAX/Pallas equivalent of the PyTorch Reshape(nn.Module)."""

    def __init__(self, *args):
        self.shape = args

    def __call__(self, x):
        total = x.size
        target = _resolve_shape(self.shape, total)
        itemsize = jnp.dtype(x.dtype).itemsize

        # Flatten row-major (matches torch contiguous .view).
        flat = jnp.reshape(x, (-1,))

        if total % _LANES == 0:
            # Lane-aligned: run the data through the identity-copy kernel
            # (no pad, no slice, lane-dense blocks, aliased output).
            flat = _pallas_identity_copy(flat, total, itemsize)
        # else: total is not a multiple of 128 lanes.  Reshape is pure
        # metadata, so the plain jnp.reshape below is exact and avoids a
        # pad/copy/slice round-trip through HBM (fastest possible path).

        return jnp.reshape(flat, target)


if __name__ == "__main__":
    key = jax.random.PRNGKey(0)
    # Small NCHW-like input, consistent with a conv-feature-map flattening use.
    x = jax.random.normal(key, (2, 4, 16, 16), dtype=jnp.float32)

    # Reshape(2, -1): flatten all but the batch dim (typical usage of Reshape).
    module = Reshape(2, -1)
    y = module(x)
    y = jax.block_until_ready(y)

    # Correctness check against plain JAX reshape (== torch .view semantics).
    ref = jnp.reshape(x, (2, -1))
    assert y.shape == (2, 4 * 16 * 16)
    assert y.dtype == x.dtype
    assert bool(jnp.all(y == ref))

    print("KERNEL_OK")
</pallas_src>

<mosaic_0001>
module attributes {stable_mosaic.version = 11 : i64} {
  func.func @_copy_kernel(%arg0: i32, %arg1: memref<1x2048xf32, #tpu.memory_space<vmem>>, %arg2: memref<1x2048xf32, #tpu.memory_space<vmem>>) attributes {dimension_semantics = [#tpu.dimension_semantics<parallel>], iteration_bounds = array<i64: 1>, scalar_prefetch = 0 : i64, scratch_operands = 0 : i64, tpu.core_type = #tpu.core_type<tc>, window_params = [{transform_indices = @transform_0, window_bounds = array<i64: 1, 2048>}, {transform_indices = @transform_1, window_bounds = array<i64: 1, 2048>}]} {
    %c0 = arith.constant 0 : index
    %c0_0 = arith.constant 0 : index
    %0 = vector.load %arg1[%c0, %c0_0] : memref<1x2048xf32, #tpu.memory_space<vmem>>, vector<1x2048xf32>
    %c0_1 = arith.constant 0 : index
    %c0_2 = arith.constant 0 : index
    %1 = vector.load %arg2[%c0_1, %c0_2] : memref<1x2048xf32, #tpu.memory_space<vmem>>, vector<1x2048xf32>
    tpu.vector_store %arg2[%c0_1, %c0_2], %0 {strides = array<i32>} : memref<1x2048xf32, #tpu.memory_space<vmem>>, vector<1x2048xf32>,
    return
  }
  func.func @transform_0(%arg0: i32) -> (i32, i32) {
    %c0_i32 = arith.constant 0 : i32
    %c0_i32_0 = arith.constant 0 : i32
    return %arg0, %c0_i32 : i32, i32
  }
  func.func @transform_1(%arg0: i32) -> (i32, i32) {
    %c0_i32 = arith.constant 0 : i32
    %c0_i32_0 = arith.constant 0 : i32
    return %arg0, %c0_i32 : i32, i32
  }
}

</mosaic_0001>

<bundles_post_ra>
// kernel: tpu_custom_call.1
= control target key start
LH: loop header
LB: loop body
LE: loop exit
PB: predicated region body
PF: predicated region fallthrough
CT: control target
= control target key end

     0   :  { %6 = vsyncpa [#allocation3], 0  ;;  %s116_s0 = inlined_call_operand.hbm [shape: f32[1,2048], index: 0, kind: input, shape index: {}, may-alias: {0,1}]   ;;  %s117_s1 = inlined_call_operand.hbm [shape: f32[1,2048], index: 1, kind: output, shape index: {}, may-alias: {0,1}]  }
   0x1   :  { %7 = vsyncpa [#allocation4], 0  ;;  %s13_s8 = sshll.u32 %s116_s0, 4  ;;  %s98_s9 = smov [#allocation2]   ;;  %s14_s8 = int_to_ptr.hbm [resolvable:$true] %s13_s8 }
   0x2   :  { %s15_s10 = sshll.u32 %s98_s9, 4  ;;  %s16_s10 = int_to_ptr.vmem [resolvable:$true] %s15_s10 }
   0x3   :  { %18 = dma.hbm_to_vmem [thread:$0]  %s14_s8, 256, %s16_s10, [#allocation3]  }
   0x4   :  { %94 = dma.done.wait [#allocation3], 256  }
   0x5   :  { %95 = vsyncadd [#allocation3], 4294967040  ;;  %s99_s11 = smov [#allocation5]   ;;  %s34_s15 = sshll.u32 %s117_s1, 4  ;;  %v23_v0 = vld [vmem:[#allocation2] sm:$0xff]  ;;  %v24_v1 = vld [vmem:[#allocation2 + $0x8] sm:$0xff]  ;;  %s35_s15 = int_to_ptr.hbm [resolvable:$true] %s34_s15 }
   0x6   :  { %s32_s12 = sshll.u32 %s99_s11, 4  ;;  %25 = vst [vmem:[#allocation5] sm:$0xff] %v23_v0  ;;  %s33_s12 = int_to_ptr.vmem [resolvable:$true] %s32_s12 }
   0x7   :  { %26 = vst [vmem:[#allocation5 + $0x8] sm:$0xff] %v24_v1 }
   0x8   :  { %37 = dma.vmem_to_hbm [thread:$0]  %s33_s12, 256, %s35_s15, [#allocation4]  }
   0x9   :  { %96 = dma.done.wait [#allocation4], 256  }
   0xa   :  { %97 = vsyncadd [#allocation4], 4294967040 }
   0xb   :  { %42 = vsyncpa [#allocation3], 1 }
   0xc   :  { %43 = vsyncpa [#allocation4], 1 }

</bundles_post_ra>
